<compile_context>
chip_gen: v5e
topology: v5e:2x2
jax: 0.10.0
libtpu: 0.0.40
codegen_flags: <defaults>
</compile_context>

<pallas_src>
from functools import partial

import jax
import jax.numpy as jnp
from jax.experimental import pallas as pl
from jax.experimental.pallas import tpu as pltpu


def _round_up(x, m):
    return ((x + m - 1) // m) * m


# ----------------------------------------------------------------------------
# Pass 1 kernel:  HW2[i] = relu((A_hat @ Z)[i] @ W1 + b1) @ W2
# ----------------------------------------------------------------------------
def _layer1_kernel(adj_ref, z_ref, w1_ref, b1_ref, w2_ref, hw2_ref, acc_ref,
                   *, k_tile, z_resident):
    k = pl.program_id(1)

    @pl.when(k == 0)
    def _():
        acc_ref[...] = jnp.zeros_like(acc_ref)

    if z_resident:
        # z is VMEM-resident (full-array block, constant index_map); slice the K chunk.
        k0 = pl.multiple_of(k * k_tile, k_tile)
        z_blk = z_ref[pl.ds(k0, k_tile), :]
    else:
        z_blk = z_ref[...]

    # (tm, tk) bf16 @ (tk, F_pad) bf16 -> f32 accumulate on the MXU
    acc_ref[...] += jnp.dot(adj_ref[...], z_blk,
                            preferred_element_type=jnp.float32)

    @pl.when(k == pl.num_programs(1) - 1)
    def _():
        az = acc_ref[...].astype(jnp.bfloat16)                         # (tm, F_pad)
        h = jnp.maximum(
            jnp.dot(az, w1_ref[...], preferred_element_type=jnp.float32)
            + b1_ref[...], 0.0)                                        # (tm, H_pad) f32
        hw2_ref[...] = jnp.dot(h.astype(jnp.bfloat16), w2_ref[...],
                               preferred_element_type=jnp.float32
                               ).astype(hw2_ref.dtype)                 # (tm, O_pad)


# ----------------------------------------------------------------------------
# Pass 2 kernel:  out[i] = (A_hat @ HW2)[i] + b2
# ----------------------------------------------------------------------------
def _layer2_kernel(adj_ref, hw2_ref, b2_ref, out_ref, acc_ref,
                   *, k_tile, hw2_resident):
    k = pl.program_id(1)

    @pl.when(k == 0)
    def _():
        acc_ref[...] = jnp.zeros_like(acc_ref)

    if hw2_resident:
        k0 = pl.multiple_of(k * k_tile, k_tile)
        hw2_blk = hw2_ref[pl.ds(k0, k_tile), :]
    else:
        hw2_blk = hw2_ref[...]

    acc_ref[...] += jnp.dot(adj_ref[...], hw2_blk,
                            preferred_element_type=jnp.float32)

    @pl.when(k == pl.num_programs(1) - 1)
    def _():
        out_ref[...] = (acc_ref[...] + b2_ref[...]).astype(out_ref.dtype)


# ----------------------------------------------------------------------------
# Glue (plain JAX): GCN symmetric normalization -> dense A_hat at the PADDED shape.
# Matches torch_geometric gcn_norm with add_remaining_self_loops (existing self-loops
# keep their weight; unit self-loops only added to nodes that lack one).
# ----------------------------------------------------------------------------
def gcn_norm_dense_padded(edge_index, edge_weight, num_nodes, n_pad,
                          out_dtype=jnp.bfloat16):
    # TODO(synk): for real sparse graphs replace this dense O(N^2) build with a CSR
    # layout + PrefetchScalarGridSpec gather-DMA aggregation kernel.
    src = edge_index[0]
    dst = edge_index[1]
    ew = edge_weight.reshape(-1).astype(jnp.float32)
    is_loop = (src == dst)
    has_loop = (jnp.zeros((num_nodes,), jnp.float32)
                .at[src].add(jnp.where(is_loop, 1.0, 0.0))) > 0.0
    loop_idx = jnp.arange(num_nodes, dtype=src.dtype)
    loop_w = jnp.where(has_loop, 0.0, 1.0)     # only add where no self-loop exists
    src = jnp.concatenate([src, loop_idx])
    dst = jnp.concatenate([dst, loop_idx])
    ew = jnp.concatenate([ew, loop_w])
    deg = jnp.zeros((num_nodes,), jnp.float32).at[dst].add(ew)
    dinv = jnp.where(deg > 0, jax.lax.rsqrt(deg), 0.0)
    norm = dinv[src] * ew * dinv[dst]
    # A_hat[target, source] = norm ; scatter directly into the padded buffer and
    # cast once (no separate pad copy afterwards).
    adj = jnp.zeros((n_pad, n_pad), jnp.float32).at[dst, src].add(norm)
    return adj.astype(out_dtype)


# ----------------------------------------------------------------------------
# Wrapper: padding, bf16 casts, tiling, two pallas_call passes.
# ----------------------------------------------------------------------------
def decoder_forward(z, edge_index, edge_attr, w1, b1, w2, b2,
                    *, row_tile=None, k_tile=None):
    N, latent_dim = z.shape
    hidden_dim = w1.shape[1]
    output_dim = w2.shape[1]

    LANE = 128

    # Tile heuristic:
    #   small N  -> single K step (one accumulator carry, no per-step overhead blowup)
    #   large N  -> >=1 MiB adj DMAs (256x2048 bf16); n_pad multiple of 2048 keeps the
    #               row-tile count even for the v7x 2-TC megacore split.
    if row_tile is None or k_tile is None:
        if N <= 2048:
            row_tile = 128
            n_pad = _round_up(N, row_tile)
            k_tile = n_pad
        else:
            row_tile = 256
            k_tile = 2048
            n_pad = _round_up(N, 2048)
    else:
        n_pad = _round_up(N, max(row_tile, k_tile))
    assert n_pad % row_tile == 0 and n_pad % k_tile == 0

    f_pad = _round_up(latent_dim, LANE)
    h_pad = _round_up(hidden_dim, LANE)
    o_pad = _round_up(output_dim, LANE)

    # Keep z (pass 1) and hw2 (pass 2) VMEM-resident across row tiles unless too big.
    resident_budget = 12 * 1024 * 1024
    z_resident = (n_pad * f_pad * 2) <= resident_budget
    hw2_resident = (n_pad * o_pad * 2) <= resident_budget

    # Normalized adjacency built directly at the padded shape, bf16 once.
    adj_p = gcn_norm_dense_padded(edge_index, edge_attr, N, n_pad, jnp.bfloat16)
    # Weights/activations: bf16 operands, f32 biases (bias add + relu stay f32).
    z_p = jnp.zeros((n_pad, f_pad), jnp.bfloat16
                    ).at[:N, :latent_dim].set(z.astype(jnp.bfloat16))
    w1_p = jnp.zeros((f_pad, h_pad), jnp.bfloat16
                     ).at[:latent_dim, :hidden_dim].set(w1.astype(jnp.bfloat16))
    b1_p = jnp.zeros((1, h_pad), jnp.float32).at[:, :hidden_dim].set(b1.reshape(1, -1))
    w2_p = jnp.zeros((h_pad, o_pad), jnp.bfloat16
                     ).at[:hidden_dim, :output_dim].set(w2.astype(jnp.bfloat16))
    b2_p = jnp.zeros((1, o_pad), jnp.float32).at[:, :output_dim].set(b2.reshape(1, -1))

    grid = (n_pad // row_tile, n_pad // k_tile)
    cparams = pltpu.CompilerParams(
        dimension_semantics=("parallel", "arbitrary"),
        # Above v5e's 16 MiB scoped default, below v7x's 64 MiB physical VMEM.
        vmem_limit_bytes=48 * 1024 * 1024,
    )

    z_spec = (pl.BlockSpec((n_pad, f_pad), lambda i, k: (0, 0)) if z_resident
              else pl.BlockSpec((k_tile, f_pad), lambda i, k: (k, 0)))
    hw2_spec = (pl.BlockSpec((n_pad, o_pad), lambda i, k: (0, 0)) if hw2_resident
                else pl.BlockSpec((k_tile, o_pad), lambda i, k: (k, 0)))

    # ---- pass 1: HW2 = relu((A_hat @ Z) @ W1 + b1) @ W2 -> (n_pad, o_pad) bf16 ----
    cost1 = pl.CostEstimate(
        flops=2 * n_pad * n_pad * f_pad
              + 2 * n_pad * (f_pad * h_pad + h_pad * o_pad),
        transcendentals=0,
        bytes_accessed=n_pad * n_pad * 2 + n_pad * f_pad * 2
                       + f_pad * h_pad * 2 + h_pad * o_pad * 2 + n_pad * o_pad * 2)
    hw2 = pl.pallas_call(
        partial(_layer1_kernel, k_tile=k_tile, z_resident=z_resident),
        out_shape=jax.ShapeDtypeStruct((n_pad, o_pad), jnp.bfloat16),
        grid_spec=pltpu.PrefetchScalarGridSpec(
            num_scalar_prefetch=0,
            grid=grid,
            in_specs=[
                pl.BlockSpec((row_tile, k_tile), lambda i, k: (i, k)),  # adj tile
                z_spec,                                                 # z (resident)
                pl.BlockSpec((f_pad, h_pad), lambda i, k: (0, 0)),      # w1 (resident)
                pl.BlockSpec((1, h_pad), lambda i, k: (0, 0)),          # b1
                pl.BlockSpec((h_pad, o_pad), lambda i, k: (0, 0)),      # w2 (resident)
            ],
            out_specs=pl.BlockSpec((row_tile, o_pad), lambda i, k: (i, 0)),
            scratch_shapes=[pltpu.VMEM((row_tile, f_pad), jnp.float32)],
        ),
        compiler_params=cparams,
        cost_estimate=cost1,
    )(adj_p, z_p, w1_p, b1_p, w2_p)

    # ---- pass 2: out = A_hat @ HW2 + b2 -> (n_pad, o_pad) f32 ----
    cost2 = pl.CostEstimate(
        flops=2 * n_pad * n_pad * o_pad,
        transcendentals=0,
        bytes_accessed=n_pad * n_pad * 2 + n_pad * o_pad * 2 + n_pad * o_pad * 4)
    out_p = pl.pallas_call(
        partial(_layer2_kernel, k_tile=k_tile, hw2_resident=hw2_resident),
        out_shape=jax.ShapeDtypeStruct((n_pad, o_pad), jnp.float32),
        grid_spec=pltpu.PrefetchScalarGridSpec(
            num_scalar_prefetch=0,
            grid=grid,
            in_specs=[
                pl.BlockSpec((row_tile, k_tile), lambda i, k: (i, k)),  # adj tile
                hw2_spec,                                               # hw2 (resident)
                pl.BlockSpec((1, o_pad), lambda i, k: (0, 0)),          # b2
            ],
            out_specs=pl.BlockSpec((row_tile, o_pad), lambda i, k: (i, 0)),
            scratch_shapes=[pltpu.VMEM((row_tile, o_pad), jnp.float32)],
        ),
        compiler_params=cparams,
        cost_estimate=cost2,
    )(adj_p, hw2, b2_p)

    return out_p[:N, :output_dim]


def glorot(key, shape):
    fan_in, fan_out = shape
    limit = jnp.sqrt(6.0 / (fan_in + fan_out))
    return jax.random.uniform(key, shape, jnp.float32, -limit, limit)


# ----------------------------------------------------------------------------
# Pure-JAX f32 reference for correctness check.
# ----------------------------------------------------------------------------
def decoder_ref(adj, z, w1, b1, w2, b2):
    h = jnp.maximum(adj @ (z @ w1) + b1.reshape(1, -1), 0.0)
    return adj @ (h @ w2) + b2.reshape(1, -1)


if __name__ == "__main__":
    # Small, module-consistent shapes
    N = 16            # number of graph nodes
    E = 32            # number of edges
    latent_dim = 8
    hidden_dim = 32
    output_dim = 8

    key = jax.random.PRNGKey(0)
    kz, ke, kw, kp1, kp2, kb1, kb2 = jax.random.split(key, 7)

    # Inputs
    z = jax.random.normal(kz, (N, latent_dim), jnp.float32)
    src = jax.random.randint(ke, (E // 2,), 0, N, jnp.int32)
    dst = jax.random.randint(jax.random.fold_in(ke, 1), (E // 2,), 0, N, jnp.int32)
    # make graph undirected
    edge_index = jnp.stack([jnp.concatenate([src, dst]),
                            jnp.concatenate([dst, src])], axis=0)      # (2, E)
    half_w = jax.random.uniform(kw, (E // 2,), jnp.float32, 0.1, 1.0)
    edge_attr = jnp.concatenate([half_w, half_w])                      # (E,)

    # Parameters (GCNConv: weight (in, out), bias (out,))
    w1 = glorot(kp1, (latent_dim, hidden_dim))
    b1 = jax.random.uniform(kb1, (hidden_dim,), jnp.float32, -0.1, 0.1)
    w2 = glorot(kp2, (hidden_dim, output_dim))
    b2 = jax.random.uniform(kb2, (output_dim,), jnp.float32, -0.1, 0.1)

    # Hot path: glue (padded adjacency scatter) + two Pallas passes, jitted together.
    out = jax.jit(decoder_forward)(z, edge_index, edge_attr, w1, b1, w2, b2)
    out = jax.block_until_ready(out)

    # f32 reference on the unpadded normalized adjacency.
    adj_ref = gcn_norm_dense_padded(edge_index, edge_attr, N, N, jnp.float32)
    ref = decoder_ref(adj_ref, z, w1, b1, w2, b2)
    assert out.shape == (N, output_dim)
    # bf16-streamed operands/weights with f32 accumulation: loosened tolerance vs f32 ref
    assert jnp.allclose(out, ref, atol=8e-2, rtol=8e-2), (
        f"max abs err {jnp.max(jnp.abs(out - ref))}")

    print("KERNEL_OK")
</pallas_src>

<mosaic_0001>
module attributes {stable_mosaic.version = 11 : i64} {
  func.func @_layer1_kernel(%arg0: i32, %arg1: i32, %arg2: memref<128x128xbf16, #tpu.memory_space<vmem>>, %arg3: memref<128x128xbf16, #tpu.memory_space<vmem>>, %arg4: memref<128x128xbf16, #tpu.memory_space<vmem>>, %arg5: memref<1x128xf32, #tpu.memory_space<vmem>>, %arg6: memref<128x128xbf16, #tpu.memory_space<vmem>>, %arg7: memref<128x128xbf16, #tpu.memory_space<vmem>>, %arg8: memref<128x128xf32, #tpu.memory_space<vmem>>) attributes {dimension_semantics = [#tpu.dimension_semantics<parallel>, #tpu.dimension_semantics<arbitrary>], iteration_bounds = array<i64: 1, 1>, scalar_prefetch = 0 : i64, scratch_operands = 1 : i64, tpu.core_type = #tpu.core_type<tc>, window_params = [{transform_indices = @transform_0, window_bounds = array<i64: 128, 128>}, {pipeline_mode = #tpu.pipeline_mode<synchronous>, transform_indices = @transform_1, window_bounds = array<i64: 128, 128>}, {pipeline_mode = #tpu.pipeline_mode<synchronous>, transform_indices = @transform_2, window_bounds = array<i64: 128, 128>}, {pipeline_mode = #tpu.pipeline_mode<synchronous>, transform_indices = @transform_3, window_bounds = array<i64: 1, 128>}, {pipeline_mode = #tpu.pipeline_mode<synchronous>, transform_indices = @transform_4, window_bounds = array<i64: 128, 128>}, {transform_indices = @transform_5, window_bounds = array<i64: 128, 128>}]} {
    %c0_i32 = arith.constant 0 : i32
    %0 = arith.cmpi eq, %arg1, %c0_i32 : i32
    %1 = arith.extui %0 : i1 to i32
    %c0_i32_0 = arith.constant 0 : i32
    %2 = arith.cmpi ne, %1, %c0_i32_0 : i32
    scf.if %2 {
      %cst_9 = arith.constant 0.000000e+00 : f32
      %15 = vector.broadcast %cst_9 : f32 to vector<128x128xf32>
      %c0_10 = arith.constant 0 : index
      %c0_11 = arith.constant 0 : index
      %16 = vector.load %arg8[%c0_10, %c0_11] : memref<128x128xf32, #tpu.memory_space<vmem>>, vector<128x128xf32>
      tpu.vector_store %arg8[%c0_10, %c0_11], %15 {strides = array<i32>} : memref<128x128xf32, #tpu.memory_space<vmem>>, vector<128x128xf32>,
    } else {
    }
    %c128_i32 = arith.constant 128 : i32
    %3 = arith.muli %arg1, %c128_i32 : i32
    %4 = tpu.assume_multiple %3, 128 : i32
    %5 = arith.index_cast %4 : i32 to index
    %c0 = arith.constant 0 : index
    %6 = vector.load %arg3[%5, %c0] : memref<128x128xbf16, #tpu.memory_space<vmem>>, vector<128x128xbf16>
    %c0_1 = arith.constant 0 : index
    %c0_2 = arith.constant 0 : index
    %7 = vector.load %arg8[%c0_1, %c0_2] : memref<128x128xf32, #tpu.memory_space<vmem>>, vector<128x128xf32>
    %c0_3 = arith.constant 0 : index
    %c0_4 = arith.constant 0 : index
    %8 = vector.load %arg2[%c0_3, %c0_4] : memref<128x128xbf16, #tpu.memory_space<vmem>>, vector<128x128xbf16>
    %cst = arith.constant dense<0.000000e+00> : vector<128x128xf32>
    %9 = tpu.matmul %8, %6, %cst {dimension_numbers = #tpu.dot_dimension_numbers<[1], [0], [0], [1], [0, 0, 1, 1], [], []>} : vector<128x128xbf16>, vector<128x128xbf16>, vector<128x128xf32> -> vector<128x128xf32>
    %10 = arith.addf %7, %9 : vector<128x128xf32>
    %c0_5 = arith.constant 0 : index
    %c0_6 = arith.constant 0 : index
    %11 = vector.load %arg8[%c0_5, %c0_6] : memref<128x128xf32, #tpu.memory_space<vmem>>, vector<128x128xf32>
    tpu.vector_store %arg8[%c0_5, %c0_6], %10 {strides = array<i32>} : memref<128x128xf32, #tpu.memory_space<vmem>>, vector<128x128xf32>,
    %c0_i32_7 = arith.constant 0 : i32
    %12 = arith.cmpi eq, %arg1, %c0_i32_7 : i32
    %13 = arith.extui %12 : i1 to i32
    %c0_i32_8 = arith.constant 0 : i32
    %14 = arith.cmpi ne, %13, %c0_i32_8 : i32
    scf.if %14 {
      %c0_9 = arith.constant 0 : index
      %c0_10 = arith.constant 0 : index
      %15 = vector.load %arg8[%c0_9, %c0_10] : memref<128x128xf32, #tpu.memory_space<vmem>>, vector<128x128xf32>
      %16 = arith.truncf %15 : vector<128x128xf32> to vector<128x128xbf16>
      %c0_11 = arith.constant 0 : index
      %c0_12 = arith.constant 0 : index
      %17 = vector.load %arg4[%c0_11, %c0_12] : memref<128x128xbf16, #tpu.memory_space<vmem>>, vector<128x128xbf16>
      %cst_13 = arith.constant dense<0.000000e+00> : vector<128x128xf32>
      %18 = tpu.matmul %16, %17, %cst_13 {dimension_numbers = #tpu.dot_dimension_numbers<[1], [0], [0], [1], [0, 0, 1, 1], [], []>} : vector<128x128xbf16>, vector<128x128xbf16>, vector<128x128xf32> -> vector<128x128xf32>
      %c0_14 = arith.constant 0 : index
      %c0_15 = arith.constant 0 : index
      %19 = vector.load %arg5[%c0_14, %c0_15] : memref<1x128xf32, #tpu.memory_space<vmem>>, vector<1x128xf32>
      %20 = vector.broadcast %19 : vector<1x128xf32> to vector<128x128xf32>
      %21 = arith.addf %18, %20 : vector<128x128xf32>
      %cst_16 = arith.constant 0.000000e+00 : f32
      %22 = vector.broadcast %cst_16 : f32 to vector<128x128xf32>
      %23 = arith.maximumf %21, %22 : vector<128x128xf32>
      %24 = arith.truncf %23 : vector<128x128xf32> to vector<128x128xbf16>
      %c0_17 = arith.constant 0 : index
      %c0_18 = arith.constant 0 : index
      %25 = vector.load %arg6[%c0_17, %c0_18] : memref<128x128xbf16, #tpu.memory_space<vmem>>, vector<128x128xbf16>
      %cst_19 = arith.constant dense<0.000000e+00> : vector<128x128xf32>
      %26 = tpu.matmul %24, %25, %cst_19 {dimension_numbers = #tpu.dot_dimension_numbers<[1], [0], [0], [1], [0, 0, 1, 1], [], []>} : vector<128x128xbf16>, vector<128x128xbf16>, vector<128x128xf32> -> vector<128x128xf32>
      %27 = arith.truncf %26 : vector<128x128xf32> to vector<128x128xbf16>
      %c0_20 = arith.constant 0 : index
      %c0_21 = arith.constant 0 : index
      %28 = vector.load %arg7[%c0_20, %c0_21] : memref<128x128xbf16, #tpu.memory_space<vmem>>, vector<128x128xbf16>
      tpu.vector_store %arg7[%c0_20, %c0_21], %27 {strides = array<i32>} : memref<128x128xbf16, #tpu.memory_space<vmem>>, vector<128x128xbf16>,
    } else {
    }
    return
  }
  func.func @transform_0(%arg0: i32, %arg1: i32) -> (i32, i32) {
    %c0_i32 = arith.constant 0 : i32
    return %arg0, %arg1 : i32, i32
  }
  func.func @transform_1(%arg0: i32, %arg1: i32) -> (i32, i32) {
    %c0_i32 = arith.constant 0 : i32
    %c0_i32_0 = arith.constant 0 : i32
    %c0_i32_1 = arith.constant 0 : i32
    return %c0_i32, %c0_i32_0 : i32, i32
  }
  func.func @transform_2(%arg0: i32, %arg1: i32) -> (i32, i32) {
    %c0_i32 = arith.constant 0 : i32
    %c0_i32_0 = arith.constant 0 : i32
    %c0_i32_1 = arith.constant 0 : i32
    return %c0_i32, %c0_i32_0 : i32, i32
  }
  func.func @transform_3(%arg0: i32, %arg1: i32) -> (i32, i32) {
    %c0_i32 = arith.constant 0 : i32
    %c0_i32_0 = arith.constant 0 : i32
    %c0_i32_1 = arith.constant 0 : i32
    return %c0_i32, %c0_i32_0 : i32, i32
  }
  func.func @transform_4(%arg0: i32, %arg1: i32) -> (i32, i32) {
    %c0_i32 = arith.constant 0 : i32
    %c0_i32_0 = arith.constant 0 : i32
    %c0_i32_1 = arith.constant 0 : i32
    return %c0_i32, %c0_i32_0 : i32, i32
  }
  func.func @transform_5(%arg0: i32, %arg1: i32) -> (i32, i32) {
    %c0_i32 = arith.constant 0 : i32
    %c0_i32_0 = arith.constant 0 : i32
    return %arg0, %c0_i32 : i32, i32
  }
}

module attributes {stable_mosaic.version = 11 : i64} {
  func.func @_layer2_kernel(%arg0: i32, %arg1: i32, %arg2: memref<128x128xbf16, #tpu.memory_space<vmem>>, %arg3: memref<128x128xbf16, #tpu.memory_space<vmem>>, %arg4: memref<1x128xf32, #tpu.memory_space<vmem>>, %arg5: memref<128x128xf32, #tpu.memory_space<vmem>>, %arg6: memref<128x128xf32, #tpu.memory_space<vmem>>) attributes {dimension_semantics = [#tpu.dimension_semantics<parallel>, #tpu.dimension_semantics<arbitrary>], iteration_bounds = array<i64: 1, 1>, scalar_prefetch = 0 : i64, scratch_operands = 1 : i64, tpu.core_type = #tpu.core_type<tc>, window_params = [{transform_indices = @transform_0, window_bounds = array<i64: 128, 128>}, {pipeline_mode = #tpu.pipeline_mode<synchronous>, transform_indices = @transform_1, window_bounds = array<i64: 128, 128>}, {pipeline_mode = #tpu.pipeline_mode<synchronous>, transform_indices = @transform_2, window_bounds = array<i64: 1, 128>}, {transform_indices = @transform_3, window_bounds = array<i64: 128, 128>}]} {
    %c0_i32 = arith.constant 0 : i32
    %0 = arith.cmpi eq, %arg1, %c0_i32 : i32
    %1 = arith.extui %0 : i1 to i32
    %c0_i32_0 = arith.constant 0 : i32
    %2 = arith.cmpi ne, %1, %c0_i32_0 : i32
    scf.if %2 {
      %cst_9 = arith.constant 0.000000e+00 : f32
      %15 = vector.broadcast %cst_9 : f32 to vector<128x128xf32>
      %c0_10 = arith.constant 0 : index
      %c0_11 = arith.constant 0 : index
      %16 = vector.load %arg6[%c0_10, %c0_11] : memref<128x128xf32, #tpu.memory_space<vmem>>, vector<128x128xf32>
      tpu.vector_store %arg6[%c0_10, %c0_11], %15 {strides = array<i32>} : memref<128x128xf32, #tpu.memory_space<vmem>>, vector<128x128xf32>,
    } else {
    }
    %c128_i32 = arith.constant 128 : i32
    %3 = arith.muli %arg1, %c128_i32 : i32
    %4 = tpu.assume_multiple %3, 128 : i32
    %5 = arith.index_cast %4 : i32 to index
    %c0 = arith.constant 0 : index
    %6 = vector.load %arg3[%5, %c0] : memref<128x128xbf16, #tpu.memory_space<vmem>>, vector<128x128xbf16>
    %c0_1 = arith.constant 0 : index
    %c0_2 = arith.constant 0 : index
    %7 = vector.load %arg6[%c0_1, %c0_2] : memref<128x128xf32, #tpu.memory_space<vmem>>, vector<128x128xf32>
    %c0_3 = arith.constant 0 : index
    %c0_4 = arith.constant 0 : index
    %8 = vector.load %arg2[%c0_3, %c0_4] : memref<128x128xbf16, #tpu.memory_space<vmem>>, vector<128x128xbf16>
    %cst = arith.constant dense<0.000000e+00> : vector<128x128xf32>
    %9 = tpu.matmul %8, %6, %cst {dimension_numbers = #tpu.dot_dimension_numbers<[1], [0], [0], [1], [0, 0, 1, 1], [], []>} : vector<128x128xbf16>, vector<128x128xbf16>, vector<128x128xf32> -> vector<128x128xf32>
    %10 = arith.addf %7, %9 : vector<128x128xf32>
    %c0_5 = arith.constant 0 : index
    %c0_6 = arith.constant 0 : index
    %11 = vector.load %arg6[%c0_5, %c0_6] : memref<128x128xf32, #tpu.memory_space<vmem>>, vector<128x128xf32>
    tpu.vector_store %arg6[%c0_5, %c0_6], %10 {strides = array<i32>} : memref<128x128xf32, #tpu.memory_space<vmem>>, vector<128x128xf32>,
    %c0_i32_7 = arith.constant 0 : i32
    %12 = arith.cmpi eq, %arg1, %c0_i32_7 : i32
    %13 = arith.extui %12 : i1 to i32
    %c0_i32_8 = arith.constant 0 : i32
    %14 = arith.cmpi ne, %13, %c0_i32_8 : i32
    scf.if %14 {
      %c0_9 = arith.constant 0 : index
      %c0_10 = arith.constant 0 : index
      %15 = vector.load %arg6[%c0_9, %c0_10] : memref<128x128xf32, #tpu.memory_space<vmem>>, vector<128x128xf32>
      %c0_11 = arith.constant 0 : index
      %c0_12 = arith.constant 0 : index
      %16 = vector.load %arg4[%c0_11, %c0_12] : memref<1x128xf32, #tpu.memory_space<vmem>>, vector<1x128xf32>
      %17 = vector.broadcast %16 : vector<1x128xf32> to vector<128x128xf32>
      %18 = arith.addf %15, %17 : vector<128x128xf32>
      %c0_13 = arith.constant 0 : index
      %c0_14 = arith.constant 0 : index
      %19 = vector.load %arg5[%c0_13, %c0_14] : memref<128x128xf32, #tpu.memory_space<vmem>>, vector<128x128xf32>
      tpu.vector_store %arg5[%c0_13, %c0_14], %18 {strides = array<i32>} : memref<128x128xf32, #tpu.memory_space<vmem>>, vector<128x128xf32>,
    } else {
    }
    return
  }
  func.func @transform_0(%arg0: i32, %arg1: i32) -> (i32, i32) {
    %c0_i32 = arith.constant 0 : i32
    return %arg0, %arg1 : i32, i32
  }
  func.func @transform_1(%arg0: i32, %arg1: i32) -> (i32, i32) {
    %c0_i32 = arith.constant 0 : i32
    %c0_i32_0 = arith.constant 0 : i32
    %c0_i32_1 = arith.constant 0 : i32
    return %c0_i32, %c0_i32_0 : i32, i32
  }
  func.func @transform_2(%arg0: i32, %arg1: i32) -> (i32, i32) {
    %c0_i32 = arith.constant 0 : i32
    %c0_i32_0 = arith.constant 0 : i32
    %c0_i32_1 = arith.constant 0 : i32
    return %c0_i32, %c0_i32_0 : i32, i32
  }
  func.func @transform_3(%arg0: i32, %arg1: i32) -> (i32, i32) {
    %c0_i32 = arith.constant 0 : i32
    %c0_i32_0 = arith.constant 0 : i32
    return %arg0, %c0_i32 : i32, i32
  }
}

</mosaic_0001>

<bundles_post_ra>
// kernel: decoder_forward.3
= control target key start
LH: loop header
LB: loop body
LE: loop exit
PB: predicated region body
PF: predicated region fallthrough
CT: control target
= control target key end

     0   :  { %s549_s1 = inlined_call_operand.vmem [shape: bf16[128,128], index: 1, kind: input, shape index: {}]   ;;  %s550_s2 = inlined_call_operand.vmem [shape: f32[1,128], index: 2, kind: input, shape index: {}]   ;;  %s551_s0 = inlined_call_operand.vmem [shape: bf16[128,128], index: 0, kind: input, shape index: {}]   ;;  %s552_s3 = inlined_call_operand.vmem [shape: f32[128,128], index: 3, kind: output, shape index: {}]  }
   0x1   :  { %v396_v0 = vld [vmem:[%s549_s1 + $0x38] sm:$0xff]  ;;  %v395_v1 = vld [vmem:[%s549_s1 + $0x30] sm:$0xff]  ;;  %v394_v2 = vld [vmem:[%s549_s1 + $0x28] sm:$0xff] }
   0x2   :  { %183 = vmatpush.bf16.msra.mxu0 %v396_v0  ;;  %405 = vmatpush.bf16.msra.mxu1 %v396_v0  ;;  %v393_v3 = vld [vmem:[%s549_s1 + $0x20] sm:$0xff]  ;;  %v392_v4 = vld [vmem:[%s549_s1 + $0x18] sm:$0xff]  ;;  %v391_v5 = vld [vmem:[%s549_s1 + $0x10] sm:$0xff] }
   0x3   :  { %406 = vmatpush.bf16.msra.mxu2 %v396_v0  ;;  %407 = vmatpush.bf16.msra.mxu3 %v396_v0  ;;  %v390_v6 = vld [vmem:[%s549_s1 + $0x8] sm:$0xff]  ;;  %v389_v7 = vld [vmem:[%s549_s1] sm:$0xff]  ;;  %v399_v9 = vld [vmem:[%s551_s0 + $0x10] sm:$0xff] }
   0x4   :  { %v397_v8 = vld [vmem:[%s551_s0] sm:$0xff]  ;;  %v403_v11 = vld [vmem:[%s551_s0 + $0x30] sm:$0xff]  ;;  %v398_v12 = vld [vmem:[%s551_s0 + $0x8] sm:$0xff] }
   0x5   :  { %v401_v10 = vld [vmem:[%s551_s0 + $0x20] sm:$0xff]  ;;  %v400_v13 = vld [vmem:[%s551_s0 + $0x18] sm:$0xff]  ;;  %v402_v14 = vld [vmem:[%s551_s0 + $0x28] sm:$0xff] }
   0x6   :  { %184 = vmatpush.bf16.msra.mxu0 %v395_v1  ;;  %408 = vmatpush.bf16.msra.mxu1 %v395_v1  ;;  %v404_v15 = vld [vmem:[%s551_s0 + $0x38] sm:$0xff]  ;;  %v429_v16 = vld [vmem:[%s550_s2] ss:$0 sm:$0xff] }
   0x7   :  { %409 = vmatpush.bf16.msra.mxu2 %v395_v1  ;;  %410 = vmatpush.bf16.msra.mxu3 %v395_v1 }
   0xa   :  { %185 = vmatpush.bf16.msra.mxu0 %v394_v2  ;;  %411 = vmatpush.bf16.msra.mxu1 %v394_v2 }
   0xb   :  { %412 = vmatpush.bf16.msra.mxu2 %v394_v2  ;;  %413 = vmatpush.bf16.msra.mxu3 %v394_v2 }
   0xe   :  { %186 = vmatpush.bf16.msra.mxu0 %v393_v3  ;;  %414 = vmatpush.bf16.msra.mxu1 %v393_v3 }
   0xf   :  { %415 = vmatpush.bf16.msra.mxu2 %v393_v3  ;;  %416 = vmatpush.bf16.msra.mxu3 %v393_v3 }
  0x12   :  { %187 = vmatpush.bf16.msra.mxu0 %v392_v4  ;;  %417 = vmatpush.bf16.msra.mxu1 %v392_v4 }
  0x13   :  { %418 = vmatpush.bf16.msra.mxu2 %v392_v4  ;;  %419 = vmatpush.bf16.msra.mxu3 %v392_v4 }
  0x16   :  { %188 = vmatpush.bf16.msra.mxu0 %v391_v5  ;;  %420 = vmatpush.bf16.msra.mxu1 %v391_v5 }
  0x17   :  { %421 = vmatpush.bf16.msra.mxu2 %v391_v5  ;;  %422 = vmatpush.bf16.msra.mxu3 %v391_v5 }
  0x1a   :  { %189 = vmatpush.bf16.msra.mxu0 %v390_v6  ;;  %423 = vmatpush.bf16.msra.mxu1 %v390_v6 }
  0x1b   :  { %424 = vmatpush.bf16.msra.mxu2 %v390_v6  ;;  %425 = vmatpush.bf16.msra.mxu3 %v390_v6 }
  0x1e   :  { %190 = vmatpush.bf16.msra.mxu0 %v389_v7  ;;  %426 = vmatpush.bf16.msra.mxu1 %v389_v7 }
  0x1f   :  { %427 = vmatpush.bf16.msra.mxu2 %v389_v7  ;;  %428 = vmatpush.bf16.msra.mxu3 %v389_v7 }
  0x21   :  { %191 = vmatmul.bf16.vlgmr.msra.gmra.mxu0 %v397_v8  ;;  %201 = vmatmul.bf16.vlgmr.msra.gmra.mxu1 %v399_v9 }
  0x22   :  { %211 = vmatmul.bf16.vlgmr.msra.gmra.mxu2 %v401_v10  ;;  %221 = vmatmul.bf16.vlgmr.msra.gmra.mxu3 %v403_v11 }
  0x31   :  { %196 = vmatmul.bf16.gmra.mxu0 %v398_v12  ;;  %206 = vmatmul.bf16.gmra.mxu1 %v400_v13 }
  0x32   :  { %216 = vmatmul.bf16.gmra.mxu2 %v402_v14  ;;  %226 = vmatmul.bf16.gmra.mxu3 %v404_v15 }
  0x9e   :  { %v192_v17 = vpop.f32.mrf.mxu0  ;;  %v202_v18 = vpop.f32.mrf.mxu1 }
  0x9f   :  { %v287_v19 = vadd.f32 %v429_v16, %v192_v17  ;;  %v291_v20 = vadd.f32 %v429_v16, %v202_v18 }
  0xa1   :  { %303 = vst [vmem:[%s552_s3] sm:$0xff] %v287_v19 }
  0xa2   :  { %307 = vst [vmem:[%s552_s3 + $0x20] sm:$0xff] %v291_v20 }
  0xa5   :  { %v212_v21 = vpop.f32.mrf.mxu2  ;;  %v222_v22 = vpop.f32.mrf.mxu3 }
  0xa6   :  { %v295_v23 = vadd.f32 %v429_v16, %v212_v21  ;;  %v299_v24 = vadd.f32 %v429_v16, %v222_v22  ;;  %v194_v25 = vpop.f32.mrf.mxu0  ;;  %v204_v26 = vpop.f32.mrf.mxu1 }
  0xa7   :  { %v288_v27 = vadd.f32 %v429_v16, %v194_v25  ;;  %v292_v28 = vadd.f32 %v429_v16, %v204_v26 }
  0xa8   :  { %311 = vst [vmem:[%s552_s3 + $0x40] sm:$0xff] %v295_v23 }
  0xa9   :  { %315 = vst [vmem:[%s552_s3 + $0x60] sm:$0xff] %v299_v24 }
  0xaa   :  { %304 = vst [vmem:[%s552_s3 + $0x8] sm:$0xff] %v288_v27 }
  0xab   :  { %308 = vst [vmem:[%s552_s3 + $0x28] sm:$0xff] %v292_v28 }
  0xad   :  { %v214_v29 = vpop.f32.mrf.mxu2  ;;  %v224_v30 = vpop.f32.mrf.mxu3 }
  0xae   :  { %v296_v31 = vadd.f32 %v429_v16, %v214_v29  ;;  %v300_v32 = vadd.f32 %v429_v16, %v224_v30  ;;  %v197_v33 = vpop.f32.mrf.mxu0  ;;  %v207_v34 = vpop.f32.mrf.mxu1 }
  0xaf   :  { %v289_v35 = vadd.f32 %v429_v16, %v197_v33  ;;  %v293_v36 = vadd.f32 %v429_v16, %v207_v34 }
  0xb0   :  { %312 = vst [vmem:[%s552_s3 + $0x48] sm:$0xff] %v296_v31 }
  0xb1   :  { %316 = vst [vmem:[%s552_s3 + $0x68] sm:$0xff] %v300_v32 }
  0xb2   :  { %305 = vst [vmem:[%s552_s3 + $0x10] sm:$0xff] %v289_v35 }
  0xb3   :  { %309 = vst [vmem:[%s552_s3 + $0x30] sm:$0xff] %v293_v36 }
  0xb5   :  { %v217_v37 = vpop.f32.mrf.mxu2  ;;  %v227_v38 = vpop.f32.mrf.mxu3 }
  0xb6   :  { %v297_v39 = vadd.f32 %v429_v16, %v217_v37  ;;  %v301_v40 = vadd.f32 %v429_v16, %v227_v38  ;;  %v199_v41 = vpop.f32.mrf.mxu0  ;;  %v209_v42 = vpop.f32.mrf.mxu1 }
  0xb7   :  { %v290_v43 = vadd.f32 %v429_v16, %v199_v41  ;;  %v294_v44 = vadd.f32 %v429_v16, %v209_v42 }
  0xb8   :  { %313 = vst [vmem:[%s552_s3 + $0x50] sm:$0xff] %v297_v39 }
  0xb9   :  { %317 = vst [vmem:[%s552_s3 + $0x70] sm:$0xff] %v301_v40 }
  0xba   :  { %306 = vst [vmem:[%s552_s3 + $0x18] sm:$0xff] %v290_v43 }
  0xbb   :  { %310 = vst [vmem:[%s552_s3 + $0x38] sm:$0xff] %v294_v44 }
  0xbd   :  { %v219_v45 = vpop.f32.mrf.mxu2  ;;  %v229_v46 = vpop.f32.mrf.mxu3 }
  0xbe   :  { %v298_v47 = vadd.f32 %v429_v16, %v219_v45  ;;  %v302_v48 = vadd.f32 %v429_v16, %v229_v46 }
  0xc0   :  { %314 = vst [vmem:[%s552_s3 + $0x58] sm:$0xff] %v298_v47 }
  0xc1   :  { %318 = vst [vmem:[%s552_s3 + $0x78] sm:$0xff] %v302_v48 }

// kernel: decoder_forward.2
= control target key start
LH: loop header
LB: loop body
LE: loop exit
PB: predicated region body
PF: predicated region fallthrough
CT: control target
= control target key end

     0   :  { %s974_s1 = inlined_call_operand.vmem [shape: bf16[128,128], index: 1, kind: input, shape index: {}]   ;;  %s975_s0 = inlined_call_operand.vmem [shape: bf16[128,128], index: 0, kind: input, shape index: {}]   ;;  %s976_s2 = inlined_call_operand.vmem [shape: bf16[128,128], index: 2, kind: input, shape index: {}]   ;;  %s977_s3 = inlined_call_operand.vmem [shape: f32[1,128], index: 3, kind: input, shape index: {}]   ;;  %s978_s4 = inlined_call_operand.vmem [shape: bf16[128,128], index: 4, kind: input, shape index: {}]   ;;  %s979_s5 = inlined_call_operand.vmem [shape: bf16[128,128], index: 5, kind: output, shape index: {}]  }
   0x1   :  { %v724_v0 = vld [vmem:[%s974_s1 + $0x38] sm:$0xff]  ;;  %v723_v1 = vld [vmem:[%s974_s1 + $0x30] sm:$0xff]  ;;  %v722_v2 = vld [vmem:[%s974_s1 + $0x28] sm:$0xff] }
   0x2   :  { %189 = vmatpush.bf16.msra.mxu0 %v724_v0  ;;  %796 = vmatpush.bf16.msra.mxu3 %v724_v0  ;;  %v721_v3 = vld [vmem:[%s974_s1 + $0x20] sm:$0xff]  ;;  %v720_v4 = vld [vmem:[%s974_s1 + $0x18] sm:$0xff]  ;;  %v719_v5 = vld [vmem:[%s974_s1 + $0x10] sm:$0xff] }
   0x3   :  { %v718_v6 = vld [vmem:[%s974_s1 + $0x8] sm:$0xff]  ;;  %v717_v7 = vld [vmem:[%s974_s1] sm:$0xff]  ;;  %v731_v9 = vld [vmem:[%s975_s0 + $0x30] sm:$0xff] }
   0x4   :  { %v725_v8 = vld [vmem:[%s975_s0] sm:$0xff]  ;;  %v726_v10 = vld [vmem:[%s975_s0 + $0x8] sm:$0xff]  ;;  %v732_v11 = vld [vmem:[%s975_s0 + $0x38] sm:$0xff] }
   0x5   :  { %v727_v12 = vld [vmem:[%s975_s0 + $0x10] sm:$0xff]  ;;  %v728_v13 = vld [vmem:[%s975_s0 + $0x18] sm:$0xff]  ;;  %v738_v16 = vld [vmem:[%s976_s2 + $0x28] sm:$0xff] }
   0x6   :  { %190 = vmatpush.bf16.msra.mxu0 %v723_v1  ;;  %797 = vmatpush.bf16.msra.mxu3 %v723_v1  ;;  %v740_v14 = vld [vmem:[%s976_s2 + $0x38] sm:$0xff]  ;;  %v739_v15 = vld [vmem:[%s976_s2 + $0x30] sm:$0xff]  ;;  %v737_v17 = vld [vmem:[%s976_s2 + $0x20] sm:$0xff] }
   0x7   :  { %365 = vmatpush.bf16.msra.mxu1 %v740_v14  ;;  %v729_v18 = vld [vmem:[%s975_s0 + $0x20] sm:$0xff]  ;;  %v736_v19 = vld [vmem:[%s976_s2 + $0x18] sm:$0xff]  ;;  %v730_v20 = vld [vmem:[%s975_s0 + $0x28] sm:$0xff] }
   0x8   :  { %v735_v21 = vld [vmem:[%s976_s2 + $0x10] sm:$0xff]  ;;  %v734_v22 = vld [vmem:[%s976_s2 + $0x8] sm:$0xff]  ;;  %v733_v23 = vld [vmem:[%s976_s2] sm:$0xff] }
   0x9   :  { %v748_v42 = vld [vmem:[%s978_s4 + $0x38] sm:$0xff]  ;;  %v747_v43 = vld [vmem:[%s978_s4 + $0x30] sm:$0xff]  ;;  %v746_v45 = vld [vmem:[%s978_s4 + $0x28] sm:$0xff] }
   0xa   :  { %191 = vmatpush.bf16.msra.mxu0 %v722_v2  ;;  %798 = vmatpush.bf16.msra.mxu3 %v722_v2  ;;  %v745_v46 = vld [vmem:[%s978_s4 + $0x20] sm:$0xff]  ;;  %v744_v52 = vld [vmem:[%s978_s4 + $0x18] sm:$0xff]  ;;  %v743_v53 = vld [vmem:[%s978_s4 + $0x10] sm:$0xff] }
   0xb   :  { %366 = vmatpush.bf16.msra.mxu1 %v739_v15  ;;  %502 = vmatpush.bf16.msra.mxu2 %v748_v42  ;;  %v742_v54 = vld [vmem:[%s978_s4 + $0x8] sm:$0xff]  ;;  %v741_v55 = vld [vmem:[%s978_s4] sm:$0xff] }
   0xc   :  { %v820_v57 = vld [vmem:[%s977_s3] ss:$0 sm:$0xff] }
   0xe   :  { %192 = vmatpush.bf16.msra.mxu0 %v721_v3  ;;  %799 = vmatpush.bf16.msra.mxu3 %v721_v3 }
   0xf   :  { %367 = vmatpush.bf16.msra.mxu1 %v738_v16  ;;  %503 = vmatpush.bf16.msra.mxu2 %v747_v43 }
  0x12   :  { %193 = vmatpush.bf16.msra.mxu0 %v720_v4  ;;  %800 = vmatpush.bf16.msra.mxu3 %v720_v4 }
  0x13   :  { %368 = vmatpush.bf16.msra.mxu1 %v737_v17  ;;  %504 = vmatpush.bf16.msra.mxu2 %v746_v45 }
  0x16   :  { %194 = vmatpush.bf16.msra.mxu0 %v719_v5  ;;  %801 = vmatpush.bf16.msra.mxu3 %v719_v5 }
  0x17   :  { %369 = vmatpush.bf16.msra.mxu1 %v736_v19  ;;  %505 = vmatpush.bf16.msra.mxu2 %v745_v46 }
  0x1a   :  { %195 = vmatpush.bf16.msra.mxu0 %v718_v6  ;;  %802 = vmatpush.bf16.msra.mxu3 %v718_v6 }
  0x1b   :  { %370 = vmatpush.bf16.msra.mxu1 %v735_v21  ;;  %506 = vmatpush.bf16.msra.mxu2 %v744_v52 }
  0x1e   :  { %196 = vmatpush.bf16.msra.mxu0 %v717_v7  ;;  %803 = vmatpush.bf16.msra.mxu3 %v717_v7 }
  0x1f   :  { %371 = vmatpush.bf16.msra.mxu1 %v734_v22  ;;  %507 = vmatpush.bf16.msra.mxu2 %v743_v53 }
  0x21   :  { %197 = vmatmul.bf16.vlgmr.msra.gmra.mxu0 %v725_v8  ;;  %227 = vmatmul.bf16.vlgmr.msra.gmra.mxu3 %v731_v9 }
  0x22   :  { %804 = vmatpush.bf16.msrb.mxu3 %v740_v14 }
  0x23   :  { %372 = vmatpush.bf16.msra.mxu1 %v733_v23  ;;  %508 = vmatpush.bf16.msra.mxu2 %v742_v54 }
  0x26   :  { %805 = vmatpush.bf16.msrb.mxu3 %v739_v15 }
  0x27   :  { %509 = vmatpush.bf16.msra.mxu2 %v741_v55 }
  0x2a   :  { %806 = vmatpush.bf16.msrb.mxu3 %v738_v16 }
  0x2e   :  { %807 = vmatpush.bf16.msrb.mxu3 %v737_v17 }
  0x31   :  { %202 = vmatmul.bf16.gmra.mxu0 %v726_v10  ;;  %232 = vmatmul.bf16.gmra.mxu3 %v732_v11 }
  0x32   :  { %808 = vmatpush.bf16.msrb.mxu3 %v736_v19 }
  0x36   :  { %809 = vmatpush.bf16.msrb.mxu3 %v735_v21 }
  0x3a   :  { %810 = vmatpush.bf16.msrb.mxu3 %v734_v22 }
  0x3e   :  { %811 = vmatpush.bf16.msrb.mxu3 %v733_v23 }
  0x41   :  { %207 = vmatmul.bf16.gmra.mxu0 %v727_v12 }
  0x42   :  { %812 = vmatpush.bf16.msra.mxu3 %v748_v42 }
  0x46   :  { %813 = vmatpush.bf16.msra.mxu3 %v747_v43 }
  0x4a   :  { %814 = vmatpush.bf16.msra.mxu3 %v746_v45 }
  0x4e   :  { %815 = vmatpush.bf16.msra.mxu3 %v745_v46 }
  0x51   :  { %212 = vmatmul.bf16.gmra.mxu0 %v728_v13 }
  0x52   :  { %816 = vmatpush.bf16.msra.mxu3 %v744_v52 }
  0x56   :  { %817 = vmatpush.bf16.msra.mxu3 %v743_v53 }
  0x5a   :  { %818 = vmatpush.bf16.msra.mxu3 %v742_v54 }
  0x5e   :  { %819 = vmatpush.bf16.msra.mxu3 %v741_v55 }
  0x61   :  { %217 = vmatmul.bf16.gmra.mxu0 %v729_v18 }
  0x71   :  { %222 = vmatmul.bf16.gmra.mxu0 %v730_v20 }
  0x9e   :  { %v198_v24 = vpop.f32.mrf.mxu0 }
  0xa4   :  { %v228_v25 = vpop.f32.mrf.mxu3 }
  0xa6   :  { %v200_v26 = vpop.f32.mrf.mxu0 }
  0xa7   :  { %v289_v27 = vpack.c.bf16 %v200_v26, %v198_v24 }
  0xa9   :  { %373 = vmatmul.bf16.vlgmr.msra.gmra.mxu1 %v289_v27 }
  0xac   :  { %v230_v28 = vpop.f32.mrf.mxu3 }
  0xad   :  { %v295_v29 = vpack.c.bf16 %v230_v28, %v228_v25 }
  0xae   :  { %v203_v30 = vpop.f32.mrf.mxu0 }
  0xaf   :  { %403 = vmatmul.bf16.vlgmr.msrb.gmra.mxu3 %v295_v29 }
  0xb4   :  { %v233_v31 = vpop.f32.mrf.mxu3 }
  0xb6   :  { %v205_v32 = vpop.f32.mrf.mxu0 }
  0xb7   :  { %v290_v33 = vpack.c.bf16 %v205_v32, %v203_v30 }
  0xb9   :  { %378 = vmatmul.bf16.gmra.mxu1 %v290_v33 }
  0xbc   :  { %v235_v34 = vpop.f32.mrf.mxu3 }
  0xbd   :  { %v296_v35 = vpack.c.bf16 %v235_v34, %v233_v31 }
  0xbe   :  { %v208_v36 = vpop.f32.mrf.mxu0 }
  0xbf   :  { %408 = vmatmul.bf16.gmra.mxu3 %v296_v35 }
  0xc6   :  { %v210_v37 = vpop.f32.mrf.mxu0 }
  0xc7   :  { %v291_v38 = vpack.c.bf16 %v210_v37, %v208_v36 }
  0xc9   :  { %383 = vmatmul.bf16.gmra.mxu1 %v291_v38 }
  0xce   :  { %v213_v39 = vpop.f32.mrf.mxu0 }
  0xd6   :  { %v215_v40 = vpop.f32.mrf.mxu0 }
  0xd7   :  { %v292_v41 = vpack.c.bf16 %v215_v40, %v213_v39 }
  0xd9   :  { %388 = vmatmul.bf16.gmra.mxu1 %v292_v41 }
  0xde   :  { %v218_v44 = vpop.f32.mrf.mxu0 }
  0xe6   :  { %v220_v47 = vpop.f32.mrf.mxu0 }
  0xe7   :  { %v293_v48 = vpack.c.bf16 %v220_v47, %v218_v44 }
  0xe9   :  { %393 = vmatmul.bf16.gmra.mxu1 %v293_v48 }
  0xee   :  { %v223_v49 = vpop.f32.mrf.mxu0 }
  0xf6   :  { %v225_v50 = vpop.f32.mrf.mxu0 }
  0xf7   :  { %v294_v51 = vpack.c.bf16 %v225_v50, %v223_v49 }
  0xf9   :  { %398 = vmatmul.bf16.gmra.mxu1 %v294_v51 }
 0x126   :  { %v374_v56 = vpop.f32.mrf.mxu1 }
 0x127   :  { %v375_v58 = vadd.f32 %v820_v57, %v374_v56 }
 0x129   :  { %v414_v61 = vmax.f32 %v375_v58, 0.0 }
 0x12e   :  { %v376_v59 = vpop.f32.mrf.mxu1 }
 0x12f   :  { %v377_v60 = vadd.f32 %v820_v57, %v376_v59 }
 0x131   :  { %v415_v62 = vmax.f32 %v377_v60, 0.0 }
 0x132   :  { %v404_v63 = vpop.f32.mrf.mxu3 }
 0x133   :  { %v430_v0 = vpack.c.bf16 %v415_v62, %v414_v61  ;;  %v405_v2 = vadd.f32 %v820_v57, %v404_v63 }
 0x135   :  { %510 = vmatmul.bf16.vlgmr.msra.gmra.mxu2 %v430_v0  ;;  %v426_v4 = vmax.f32 %v405_v2, 0.0 }
 0x136   :  { %v379_v1 = vpop.f32.mrf.mxu1 }
 0x137   :  { %v380_v6 = vadd.f32 %v820_v57, %v379_v1 }
 0x139   :  { %v416_v11 = vmax.f32 %v380_v6, 0.0 }
 0x13a   :  { %v406_v3 = vpop.f32.mrf.mxu3 }
 0x13b   :  { %v407_v5 = vadd.f32 %v820_v57, %v406_v3 }
 0x13d   :  { %v427_v7 = vmax.f32 %v407_v5, 0.0 }
 0x13e   :  { %v381_v8 = vpop.f32.mrf.mxu1 }
 0x13f   :  { %v382_v9 = vadd.f32 %v820_v57, %v381_v8  ;;  %v436_v10 = vpack.c.bf16 %v427_v7, %v426_v4 }
 0x141   :  { %v417_v12 = vmax.f32 %v382_v9, 0.0  ;;  %540 = vmatmul.bf16.vlgmr.msra.gmra.mxu3 %v436_v10 }
 0x142   :  { %v409_v13 = vpop.f32.mrf.mxu3 }
 0x143   :  { %v431_v14 = vpack.c.bf16 %v417_v12, %v416_v11  ;;  %v410_v16 = vadd.f32 %v820_v57, %v409_v13 }
 0x145   :  { %515 = vmatmul.bf16.gmra.mxu2 %v431_v14  ;;  %v428_v18 = vmax.f32 %v410_v16, 0.0 }
 0x146   :  { %v384_v15 = vpop.f32.mrf.mxu1 }
 0x147   :  { %v385_v20 = vadd.f32 %v820_v57, %v384_v15 }
 0x149   :  { %v418_v25 = vmax.f32 %v385_v20, 0.0 }
 0x14a   :  { %v411_v17 = vpop.f32.mrf.mxu3 }
 0x14b   :  { %v412_v19 = vadd.f32 %v820_v57, %v411_v17 }
 0x14d   :  { %v429_v21 = vmax.f32 %v412_v19, 0.0 }
 0x14e   :  { %v386_v22 = vpop.f32.mrf.mxu1 }
 0x14f   :  { %v387_v23 = vadd.f32 %v820_v57, %v386_v22  ;;  %v437_v24 = vpack.c.bf16 %v429_v21, %v428_v18 }
 0x151   :  { %v419_v26 = vmax.f32 %v387_v23, 0.0  ;;  %545 = vmatmul.bf16.gmra.mxu3 %v437_v24 }
 0x153   :  { %v432_v27 = vpack.c.bf16 %v419_v26, %v418_v25 }
 0x155   :  { %520 = vmatmul.bf16.gmra.mxu2 %v432_v27 }
 0x156   :  { %v389_v28 = vpop.f32.mrf.mxu1 }
 0x157   :  { %v390_v29 = vadd.f32 %v820_v57, %v389_v28 }
 0x159   :  { %v420_v32 = vmax.f32 %v390_v29, 0.0 }
 0x15e   :  { %v391_v30 = vpop.f32.mrf.mxu1 }
 0x15f   :  { %v392_v31 = vadd.f32 %v820_v57, %v391_v30 }
 0x161   :  { %v421_v33 = vmax.f32 %v392_v31, 0.0 }
 0x163   :  { %v433_v34 = vpack.c.bf16 %v421_v33, %v420_v32 }
 0x165   :  { %525 = vmatmul.bf16.gmra.mxu2 %v433_v34 }
 0x166   :  { %v394_v35 = vpop.f32.mrf.mxu1 }
 0x167   :  { %v395_v36 = vadd.f32 %v820_v57, %v394_v35 }
 0x169   :  { %v422_v39 = vmax.f32 %v395_v36, 0.0 }
 0x16e   :  { %v396_v37 = vpop.f32.mrf.mxu1 }
 0x16f   :  { %v397_v38 = vadd.f32 %v820_v57, %v396_v37 }
 0x171   :  { %v423_v40 = vmax.f32 %v397_v38, 0.0 }
 0x173   :  { %v434_v41 = vpack.c.bf16 %v423_v40, %v422_v39 }
 0x175   :  { %530 = vmatmul.bf16.gmra.mxu2 %v434_v41 }
 0x176   :  { %v399_v42 = vpop.f32.mrf.mxu1 }
 0x177   :  { %v400_v43 = vadd.f32 %v820_v57, %v399_v42 }
 0x179   :  { %v424_v46 = vmax.f32 %v400_v43, 0.0 }
 0x17e   :  { %v401_v44 = vpop.f32.mrf.mxu1 }
 0x17f   :  { %v402_v45 = vadd.f32 %v820_v57, %v401_v44 }
 0x181   :  { %v425_v47 = vmax.f32 %v402_v45, 0.0 }
 0x183   :  { %v435_v48 = vpack.c.bf16 %v425_v47, %v424_v46 }
 0x185   :  { %535 = vmatmul.bf16.gmra.mxu2 %v435_v48 }
 0x1b8   :  { %v511_v49 = vpop.f32.mrf.mxu2 }
 0x1c0   :  { %v513_v50 = vpop.f32.mrf.mxu2 }
 0x1c1   :  { %v752_v51 = vpack.c.bf16 %v513_v50, %v511_v49 }
 0x1c3   :  { %753 = vst [vmem:[%s979_s5] sm:$0xff] %v752_v51  }
 0x1c4   :  { %v541_v52 = vpop.f32.mrf.mxu3 }
 0x1c8   :  { %v516_v53 = vpop.f32.mrf.mxu2 }
 0x1cc   :  { %v543_v54 = vpop.f32.mrf.mxu3 }
 0x1cd   :  { %v782_v55 = vpack.c.bf16 %v543_v54, %v541_v52 }
 0x1cf   :  { %794 = vst [vmem:[%s979_s5 + $0x30] sm:$0xff] %v782_v55  }
 0x1d0   :  { %v518_v56 = vpop.f32.mrf.mxu2 }
 0x1d1   :  { %v757_v57 = vpack.c.bf16 %v518_v56, %v516_v53 }
 0x1d3   :  { %789 = vst [vmem:[%s979_s5 + $0x8] sm:$0xff] %v757_v57  }
 0x1d4   :  { %v546_v58 = vpop.f32.mrf.mxu3 }
 0x1d8   :  { %v521_v59 = vpop.f32.mrf.mxu2 }
 0x1dc   :  { %v548_v60 = vpop.f32.mrf.mxu3 }
 0x1dd   :  { %v787_v61 = vpack.c.bf16 %v548_v60, %v546_v58 }
 0x1df   :  { %795 = vst [vmem:[%s979_s5 + $0x38] sm:$0xff] %v787_v61  }
 0x1e0   :  { %v523_v62 = vpop.f32.mrf.mxu2 }
 0x1e1   :  { %v762_v63 = vpack.c.bf16 %v523_v62, %v521_v59 }
 0x1e3   :  { %790 = vst [vmem:[%s979_s5 + $0x10] sm:$0xff] %v762_v63  }
 0x1e8   :  { %v526_v0 = vpop.f32.mrf.mxu2 }
 0x1f0   :  { %v528_v1 = vpop.f32.mrf.mxu2 }
 0x1f1   :  { %v767_v2 = vpack.c.bf16 %v528_v1, %v526_v0 }
 0x1f3   :  { %791 = vst [vmem:[%s979_s5 + $0x18] sm:$0xff] %v767_v2  }
 0x1f8   :  { %v531_v3 = vpop.f32.mrf.mxu2 }
 0x200   :  { %v533_v4 = vpop.f32.mrf.mxu2 }
 0x201   :  { %v772_v5 = vpack.c.bf16 %v533_v4, %v531_v3 }
 0x203   :  { %792 = vst [vmem:[%s979_s5 + $0x20] sm:$0xff] %v772_v5  }
 0x208   :  { %v536_v6 = vpop.f32.mrf.mxu2 }
 0x210   :  { %v538_v7 = vpop.f32.mrf.mxu2 }
 0x211   :  { %v777_v8 = vpack.c.bf16 %v538_v7, %v536_v6 }
 0x213   :  { %793 = vst [vmem:[%s979_s5 + $0x28] sm:$0xff] %v777_v8  }

</bundles_post_ra>
